<compile_context>
chip_gen: v6e
topology: v6e:2x2x1
jax: 0.10.0
libtpu: 0.0.40
codegen_flags: <defaults>
</compile_context>

<pallas_src>
import functools

import jax
import jax.numpy as jnp
from jax import lax
from jax.experimental import pallas as pl
from jax.experimental.pallas import tpu as pltpu


def _chip_constants():
    """Generation-aware VMEM budgets (v5e/v6e: 128 MiB VMEM, v7x: 64 MiB)."""
    vmem_bytes = None
    try:
        info = pltpu.get_tpu_info()
        vmem_bytes = getattr(info, "vmem_capacity_bytes", None)
    except Exception:
        vmem_bytes = None
    if vmem_bytes is None:
        vmem_bytes = 64 * 1024 * 1024          # conservative fallback (v7x-sized)
    if vmem_bytes >= 100 * 1024 * 1024:        # v5e / v6e class
        return {
            "vmem_limit": 64 * 1024 * 1024,
            "max_block": 8 * 1024 * 1024,
            "fused_budget": 28 * 1024 * 1024,  # in + out, double-buffered (4x block)
            "small_vmem": False,
        }
    return {                                    # v7x class (64 MiB VMEM, 2 TCs)
        "vmem_limit": 44 * 1024 * 1024,
        "max_block": 5 * 1024 * 1024,
        "fused_budget": 18 * 1024 * 1024,
        "small_vmem": True,
    }


def _pick_hw_tile(hw128, max_lanes):
    """Largest multiple-of-128 tile <= max_lanes, preferring divisors of hw128."""
    n = hw128 // 128
    cap = max(1, max_lanes // 128)
    if n <= cap:
        return hw128
    best = 1
    for d in range(cap, 0, -1):
        if n % d == 0:
            best = d
            break
    tile = best * 128
    if tile * 2 < cap * 128 and cap * 128 >= 512:
        # No good divisor (e.g. prime chunk count): use the largest lane-dense
        # tile and accept one ragged trailing tile (handled by in-kernel masks).
        tile = cap * 128
    return tile


def _channel_conv_sigmoid(m, w_ref, b_ref, kernel_size):
    """K-tap conv along the channel (sublane) axis of a (C, 1) f32 column."""
    c = m.shape[0]
    pad = (kernel_size - 1) // 2
    if pad > 0:
        z = jnp.zeros((pad, 1), jnp.float32)
        mp = jnp.concatenate([z, m, z], axis=0)           # (C + 2*pad, 1)
    else:
        mp = m
    a = jnp.zeros((c, 1), jnp.float32)
    for k in range(kernel_size):                          # static unroll of taps
        a = a + w_ref[0, k] * mp[k:k + c, :]
    return jax.nn.sigmoid(a + b_ref[0, 0])                # (C, 1) f32


def _eca_fused_kernel(x_ref, w_ref, b_ref, o_ref, *, kernel_size, hw_true, mask_tail):
    # x_ref: (C, HW128) native dtype; one read + one write of x per batch elem.
    xs = x_ref[...]
    if mask_tail:
        lane = lax.broadcasted_iota(jnp.int32, xs.shape, 1)
        xs_sum_src = jnp.where(lane < hw_true, xs, jnp.zeros_like(xs))
    else:
        xs_sum_src = xs
    s = jnp.sum(xs_sum_src, axis=-1, keepdims=True, dtype=jnp.float32)   # (C, 1)
    m = s * (1.0 / hw_true)
    att = _channel_conv_sigmoid(m, w_ref, b_ref, kernel_size)
    # Out-of-bounds lanes (if any) are dropped on writeback.
    o_ref[...] = xs * att.astype(o_ref.dtype)


def _eca_psum_kernel(x_ref, psum_ref, *, hw_true, hw_tile, mask_tail):
    # Pass 1: per-tile partial sums; both grid axes parallel (megacore-friendly).
    xs = x_ref[...]                                        # (C, hw_tile) native
    if mask_tail:
        remaining = hw_true - pl.program_id(1) * hw_tile
        lane = lax.broadcasted_iota(jnp.int32, xs.shape, 1)
        xs = jnp.where(lane < remaining, xs, jnp.zeros_like(xs))
    psum_ref[...] = jnp.sum(xs, axis=-1, keepdims=True, dtype=jnp.float32)


def _eca_combine_kernel(psum_ref, w_ref, b_ref, att_ref, *, kernel_size, hw_true):
    # Tiny combine: sum partial sums, channel conv, sigmoid, emit in x.dtype.
    s = jnp.sum(psum_ref[...], axis=-1, keepdims=True)     # (C, 1) f32
    m = s * (1.0 / hw_true)
    att = _channel_conv_sigmoid(m, w_ref, b_ref, kernel_size)
    att_ref[...] = att.astype(att_ref.dtype)


def _eca_scale_kernel(x_ref, a_ref, o_ref):
    # Pass 2: broadcast multiply, native dtype, lane-dense tiles.
    o_ref[...] = x_ref[...] * a_ref[...]


def eca_attention(x, conv_weight, conv_bias, kernel_size=3, *,
                  fused_vmem_budget=None, max_block_bytes=None,
                  vmem_limit_bytes=None, donate_input=False):
    """x: (B, C, H, W); conv_weight: (1, 1, K); conv_bias: (1,)."""
    B, C, H, W = x.shape
    HW = H * W
    itemsize = jnp.dtype(x.dtype).itemsize

    cc = _chip_constants()
    if fused_vmem_budget is None:
        fused_vmem_budget = cc["fused_budget"]
    if max_block_bytes is None:
        max_block_bytes = cc["max_block"]
    if vmem_limit_bytes is None:
        vmem_limit_bytes = cc["vmem_limit"]

    hw128 = pl.cdiv(HW, 128) * 128
    max_lanes = max(128, (max_block_bytes // max(C * itemsize, 1)) // 128 * 128)
    # TODO(synk): add channel (C) tiling for very large C where C*128*itemsize
    # already exceeds max_block_bytes.
    hw_tile = _pick_hw_tile(hw128, max_lanes)
    n_hw = pl.cdiv(HW, hw_tile)

    x_flat = x.reshape(B, C, HW)                           # contiguous reshape, no copy
    w2 = conv_weight.reshape(1, kernel_size).astype(jnp.float32)
    b2 = conv_bias.reshape(1, 1).astype(jnp.float32)

    fused_fits = 4 * C * hw128 * itemsize <= fused_vmem_budget
    # On v7x (2 TensorCores) a B==1 fused call is a single grid step on one
    # core; fall back to the two-pass path which keeps both cores busy.
    use_fused = fused_fits and not (cc["small_vmem"] and B < 2)

    io_alias = {0: 0} if donate_input else {}

    if use_fused:
        kernel = functools.partial(_eca_fused_kernel, kernel_size=kernel_size,
                                   hw_true=HW, mask_tail=(HW % 128 != 0))
        out = pl.pallas_call(
            kernel,
            out_shape=jax.ShapeDtypeStruct((B, C, HW), x.dtype),
            grid_spec=pltpu.PrefetchScalarGridSpec(
                num_scalar_prefetch=0,
                grid=(B,),
                in_specs=[
                    pl.BlockSpec((pl.Squeezed(), C, hw128), lambda b: (b, 0, 0)),
                    pl.BlockSpec((1, kernel_size), lambda b: (0, 0),
                                 memory_space=pltpu.MemorySpace.SMEM),
                    pl.BlockSpec((1, 1), lambda b: (0, 0),
                                 memory_space=pltpu.MemorySpace.SMEM),
                ],
                out_specs=pl.BlockSpec((pl.Squeezed(), C, hw128),
                                       lambda b: (b, 0, 0)),
            ),
            compiler_params=pltpu.CompilerParams(
                dimension_semantics=("parallel",),
                vmem_limit_bytes=vmem_limit_bytes),
            cost_estimate=pl.CostEstimate(
                flops=int(2 * B * C * HW),
                transcendentals=int(B * C),
                bytes_accessed=int(2 * B * C * HW * itemsize)),
            input_output_aliases=io_alias,
        )(x_flat, w2, b2)
    else:
        # Pass 1: per-tile partial sums (B, C, n_hw) f32, fully parallel grid.
        psum_kernel = functools.partial(_eca_psum_kernel, hw_true=HW,
                                        hw_tile=hw_tile,
                                        mask_tail=(HW % hw_tile != 0))
        psum = pl.pallas_call(
            psum_kernel,
            out_shape=jax.ShapeDtypeStruct((B, C, n_hw), jnp.float32),
            grid_spec=pltpu.PrefetchScalarGridSpec(
                num_scalar_prefetch=0,
                grid=(B, n_hw),
                in_specs=[pl.BlockSpec((pl.Squeezed(), C, hw_tile),
                                       lambda b, h: (b, 0, h))],
                out_specs=pl.BlockSpec((pl.Squeezed(), C, 1),
                                       lambda b, h: (b, 0, h)),
            ),
            compiler_params=pltpu.CompilerParams(
                dimension_semantics=("parallel", "parallel"),
                vmem_limit_bytes=vmem_limit_bytes),
            cost_estimate=pl.CostEstimate(
                flops=int(B * C * HW),
                transcendentals=0,
                bytes_accessed=int(B * C * HW * itemsize + B * C * n_hw * 4)),
        )(x_flat)

        # Combine: sum partials + K-tap channel conv + sigmoid -> (B, C, 1) x.dtype.
        combine_kernel = functools.partial(_eca_combine_kernel,
                                           kernel_size=kernel_size, hw_true=HW)
        att = pl.pallas_call(
            combine_kernel,
            out_shape=jax.ShapeDtypeStruct((B, C, 1), x.dtype),
            grid_spec=pltpu.PrefetchScalarGridSpec(
                num_scalar_prefetch=0,
                grid=(B,),
                in_specs=[
                    pl.BlockSpec((pl.Squeezed(), C, n_hw), lambda b: (b, 0, 0)),
                    pl.BlockSpec((1, kernel_size), lambda b: (0, 0),
                                 memory_space=pltpu.MemorySpace.SMEM),
                    pl.BlockSpec((1, 1), lambda b: (0, 0),
                                 memory_space=pltpu.MemorySpace.SMEM),
                ],
                out_specs=pl.BlockSpec((pl.Squeezed(), C, 1), lambda b: (b, 0, 0)),
            ),
            compiler_params=pltpu.CompilerParams(
                dimension_semantics=("parallel",),
                vmem_limit_bytes=vmem_limit_bytes),
            cost_estimate=pl.CostEstimate(
                flops=int(B * C * (n_hw + 2 * kernel_size)),
                transcendentals=int(B * C),
                bytes_accessed=int(B * C * n_hw * 4 + B * C * itemsize)),
        )(psum, w2, b2)

        # Pass 2: tiled broadcast multiply; both grid axes parallel (megacore).
        out = pl.pallas_call(
            _eca_scale_kernel,
            out_shape=jax.ShapeDtypeStruct((B, C, HW), x.dtype),
            grid_spec=pltpu.PrefetchScalarGridSpec(
                num_scalar_prefetch=0,
                grid=(B, n_hw),
                in_specs=[
                    pl.BlockSpec((pl.Squeezed(), C, hw_tile),
                                 lambda b, h: (b, 0, h)),
                    pl.BlockSpec((pl.Squeezed(), C, 1),
                                 lambda b, h: (b, 0, 0)),
                ],
                out_specs=pl.BlockSpec((pl.Squeezed(), C, hw_tile),
                                       lambda b, h: (b, 0, h)),
            ),
            compiler_params=pltpu.CompilerParams(
                dimension_semantics=("parallel", "parallel"),
                vmem_limit_bytes=vmem_limit_bytes),
            cost_estimate=pl.CostEstimate(
                flops=int(B * C * HW),
                transcendentals=0,
                bytes_accessed=int(2 * B * C * HW * itemsize + B * C * itemsize)),
            input_output_aliases=io_alias,
        )(x_flat, att)

    return out.reshape(B, C, H, W)


def eca_reference(x, conv_weight, conv_bias, kernel_size=3):
    """Pure-JAX reference matching the PyTorch forward."""
    B, C, H, W = x.shape
    pad = (kernel_size - 1) // 2
    y = jnp.mean(x, axis=(2, 3))                           # (B, C)
    yp = jnp.pad(y, ((0, 0), (pad, pad)))
    w = conv_weight.reshape(-1)
    conv = sum(w[k] * yp[:, k:k + C] for k in range(kernel_size)) + conv_bias[0]
    att = jax.nn.sigmoid(conv)                             # (B, C)
    return x * att[:, :, None, None]


if __name__ == "__main__":
    kernel_size = 3
    key = jax.random.PRNGKey(0)
    kx, kw, kb, kx2 = jax.random.split(key, 4)

    bound = (1.0 / kernel_size) ** 0.5
    conv_weight = jax.random.uniform(kw, (1, 1, kernel_size),
                                     minval=-bound, maxval=bound,
                                     dtype=jnp.float32)
    conv_bias = jax.random.uniform(kb, (1,), minval=-bound, maxval=bound,
                                   dtype=jnp.float32)

    # Case 1: HW a multiple of 128 (no tail masking needed).
    x = jax.random.normal(kx, (2, 4, 16, 16), dtype=jnp.float32)
    ref = eca_reference(x, conv_weight, conv_bias, kernel_size)

    out_fused = jax.block_until_ready(
        eca_attention(x, conv_weight, conv_bias, kernel_size))
    assert out_fused.shape == x.shape and out_fused.dtype == x.dtype
    assert jnp.allclose(out_fused, ref, atol=1e-5, rtol=1e-5)

    out_tiled = jax.block_until_ready(
        eca_attention(x, conv_weight, conv_bias, kernel_size,
                      fused_vmem_budget=0))
    assert jnp.allclose(out_tiled, ref, atol=1e-5, rtol=1e-5)

    out_multi = jax.block_until_ready(
        eca_attention(x, conv_weight, conv_bias, kernel_size,
                      fused_vmem_budget=0, max_block_bytes=2048))
    assert jnp.allclose(out_multi, ref, atol=1e-5, rtol=1e-5)

    # Case 2: ragged HW (15*15 = 225) exercises in-kernel tail masking,
    # partial last-block reads and dropped OOB writes (no wrapper pad/slice).
    x2 = jax.random.normal(kx2, (2, 4, 15, 15), dtype=jnp.float32)
    ref2 = eca_reference(x2, conv_weight, conv_bias, kernel_size)

    out2_fused = jax.block_until_ready(
        eca_attention(x2, conv_weight, conv_bias, kernel_size))
    assert jnp.allclose(out2_fused, ref2, atol=1e-5, rtol=1e-5)

    out2_tiled = jax.block_until_ready(
        eca_attention(x2, conv_weight, conv_bias, kernel_size,
                      fused_vmem_budget=0, max_block_bytes=2048))
    assert jnp.allclose(out2_tiled, ref2, atol=1e-5, rtol=1e-5)

    print("KERNEL_OK")
</pallas_src>

<mosaic_0001>
module attributes {stable_mosaic.version = 11 : i64} {
  func.func @_eca_fused_kernel(%arg0: i32, %arg1: memref<1x4x256xf32, #tpu.memory_space<vmem>>, %arg2: memref<1x3xf32, #tpu.memory_space<smem>>, %arg3: memref<1x1xf32, #tpu.memory_space<smem>>, %arg4: memref<1x4x256xf32, #tpu.memory_space<vmem>>) attributes {dimension_semantics = [#tpu.dimension_semantics<parallel>], iteration_bounds = array<i64: 2>, scalar_prefetch = 0 : i64, scratch_operands = 0 : i64, tpu.core_type = #tpu.core_type<tc>, window_params = [{transform_indices = @transform_0, window_bounds = array<i64: 1, 4, 256>}, {transform_indices = @transform_1, window_bounds = array<i64: 1, 3>}, {transform_indices = @transform_2, window_bounds = array<i64: 1, 1>}, {transform_indices = @transform_3, window_bounds = array<i64: 1, 4, 256>}]} {
    %c0 = arith.constant 0 : index
    %c0_0 = arith.constant 0 : index
    %c0_1 = arith.constant 0 : index
    %0 = vector.load %arg1[%c0, %c0_0, %c0_1] : memref<1x4x256xf32, #tpu.memory_space<vmem>>, vector<1x4x256xf32>
    %1 = vector.shape_cast %0 : vector<1x4x256xf32> to vector<4x256xf32>
    %cst = arith.constant dense<0.000000e+00> : vector<4xf32>
    %2 = vector.multi_reduction <add>, %1, %cst [1] : vector<4x256xf32> to vector<4xf32>
    %3 = vector.shape_cast %2 : vector<4xf32> to vector<4x1xf32>
    %cst_2 = arith.constant 3.906250e-03 : f32
    %4 = vector.broadcast %cst_2 : f32 to vector<4x1xf32>
    %5 = arith.mulf %3, %4 : vector<4x1xf32>
    %cst_3 = arith.constant 0.000000e+00 : f32
    %6 = vector.broadcast %cst_3 : f32 to vector<1x1xf32>
    %7 = tpu.concatenate %6, %5, %6 in 0 : vector<1x1xf32>, vector<4x1xf32>, vector<1x1xf32> -> vector<6x1xf32>
    %cst_4 = arith.constant 0.000000e+00 : f32
    %8 = vector.broadcast %cst_4 : f32 to vector<4x1xf32>
    %c0_5 = arith.constant 0 : index
    %c0_6 = arith.constant 0 : index
    %9 = memref.load %arg2[%c0_5, %c0_6] : memref<1x3xf32, #tpu.memory_space<smem>>
    %10 = vector.extract_strided_slice %7 {offsets = [0, 0], sizes = [4, 1], strides = [1, 1]} : vector<6x1xf32> to vector<4x1xf32>
    %11 = vector.broadcast %9 : f32 to vector<4x1xf32>
    %12 = arith.mulf %11, %10 : vector<4x1xf32>
    %13 = arith.addf %8, %12 : vector<4x1xf32>
    %c0_7 = arith.constant 0 : index
    %c1 = arith.constant 1 : index
    %14 = memref.load %arg2[%c0_7, %c1] : memref<1x3xf32, #tpu.memory_space<smem>>
    %15 = vector.extract_strided_slice %7 {offsets = [1, 0], sizes = [4, 1], strides = [1, 1]} : vector<6x1xf32> to vector<4x1xf32>
    %16 = vector.broadcast %14 : f32 to vector<4x1xf32>
    %17 = arith.mulf %16, %15 : vector<4x1xf32>
    %18 = arith.addf %13, %17 : vector<4x1xf32>
    %c0_8 = arith.constant 0 : index
    %c2 = arith.constant 2 : index
    %19 = memref.load %arg2[%c0_8, %c2] : memref<1x3xf32, #tpu.memory_space<smem>>
    %20 = vector.extract_strided_slice %7 {offsets = [2, 0], sizes = [4, 1], strides = [1, 1]} : vector<6x1xf32> to vector<4x1xf32>
    %21 = vector.broadcast %19 : f32 to vector<4x1xf32>
    %22 = arith.mulf %21, %20 : vector<4x1xf32>
    %23 = arith.addf %18, %22 : vector<4x1xf32>
    %c0_9 = arith.constant 0 : index
    %c0_10 = arith.constant 0 : index
    %24 = memref.load %arg3[%c0_9, %c0_10] : memref<1x1xf32, #tpu.memory_space<smem>>
    %25 = vector.broadcast %24 : f32 to vector<4x1xf32>
    %26 = arith.addf %23, %25 : vector<4x1xf32>
    %27 = arith.negf %26 : vector<4x1xf32>
    %28 = math.exp %27 : vector<4x1xf32>
    %cst_11 = arith.constant 1.000000e+00 : f32
    %29 = vector.broadcast %cst_11 : f32 to vector<4x1xf32>
    %30 = arith.addf %29, %28 : vector<4x1xf32>
    %31 = arith.divf %29, %30 : vector<4x1xf32>
    %32 = vector.broadcast %31 : vector<4x1xf32> to vector<4x256xf32>
    %33 = arith.mulf %1, %32 : vector<4x256xf32>
    %c0_12 = arith.constant 0 : index
    %c0_13 = arith.constant 0 : index
    %c0_14 = arith.constant 0 : index
    %34 = vector.load %arg4[%c0_12, %c0_13, %c0_14] : memref<1x4x256xf32, #tpu.memory_space<vmem>>, vector<1x4x256xf32>
    %35 = vector.shape_cast %34 : vector<1x4x256xf32> to vector<4x256xf32>
    %36 = vector.shape_cast %33 : vector<4x256xf32> to vector<1x4x256xf32>
    tpu.vector_store %arg4[%c0_12, %c0_13, %c0_14], %36 {strides = array<i32>} : memref<1x4x256xf32, #tpu.memory_space<vmem>>, vector<1x4x256xf32>,
    return
  }
  func.func @transform_0(%arg0: i32) -> (i32, i32, i32) {
    %c0_i32 = arith.constant 0 : i32
    %c0_i32_0 = arith.constant 0 : i32
    %c0_i32_1 = arith.constant 0 : i32
    return %arg0, %c0_i32, %c0_i32_0 : i32, i32, i32
  }
  func.func @transform_1(%arg0: i32) -> (i32, i32) {
    %c0_i32 = arith.constant 0 : i32
    %c0_i32_0 = arith.constant 0 : i32
    %c0_i32_1 = arith.constant 0 : i32
    return %c0_i32, %c0_i32_0 : i32, i32
  }
  func.func @transform_2(%arg0: i32) -> (i32, i32) {
    %c0_i32 = arith.constant 0 : i32
    %c0_i32_0 = arith.constant 0 : i32
    %c0_i32_1 = arith.constant 0 : i32
    return %c0_i32, %c0_i32_0 : i32, i32
  }
  func.func @transform_3(%arg0: i32) -> (i32, i32, i32) {
    %c0_i32 = arith.constant 0 : i32
    %c0_i32_0 = arith.constant 0 : i32
    %c0_i32_1 = arith.constant 0 : i32
    return %arg0, %c0_i32, %c0_i32_0 : i32, i32, i32
  }
}

</mosaic_0001>

<bundles_post_ra>
// kernel: tpu_custom_call.1
= control target key start
LH: loop header
LB: loop body
LE: loop exit
PB: predicated region body
PF: predicated region fallthrough
CT: control target
= control target key end

     0   :  { %s755_s0 = inlined_call_operand.hbm [shape: f32[2,4,256], index: 0, kind: input, shape index: {}]   ;;  %s756_s1 = inlined_call_operand.vmem [shape: f32[1,3], index: 1, kind: input, shape index: {}]   ;;  %s757_s2 = inlined_call_operand.<no memory space> [shape: f32[1,1], index: 2, kind: input, shape index: {}]   ;;  %s758_s3 = inlined_call_operand.hbm [shape: f32[2,4,256], index: 3, kind: output, shape index: {}]  }
   0x1   :  { %8 = sst [smem:[#allocation2]] %s757_s2 }
   0x2   :  { %9 = vsyncpa [#allocation4], 0 }
   0x3   :  { %11 = vsyncpa [#allocation4 + $0x1], 0 }
   0x4   :  { %12 = vsyncpa [#allocation6], 0 }
   0x5   :  { %13 = vsyncpa [#allocation5], 0 }
   0x6   :  { %15 = vsyncpa [#allocation5 + $0x1], 0  ;;  %s585_s14 = smov 0   ;;  %s587_s15 = smov 0  }
   0x7   :  { %s589_s16 = smov 0   ;;  %s591_s17 = smov 0  }
   0x8 LB: > { %s606_s2 = sadd.s32 4294967295, %s555_s17   ;;  %s358_s18 = sadd.s32 4294967294, %s555_s17   ;;  %s555_s17 = sphi %s591_s17, %s781_s17   ;;  %s551_s16 = sphi %s589_s16, %s780_s16   ;;  %s547_s15 = sphi %s587_s15, %s779_s15   ;;  %s543_s14 = sphi %s585_s14, %s778_s14  }
   0x9   : > { %p41_p0 = scmp.ne.s32.totalorder %s547_s15, %s543_s14  ;;  %p759_p1 = scmp.eq.s32.totalorder %s606_s2, 0 }
   0xa   : > { %p113_p3 = scmp.eq.s32.totalorder %s358_s18, 1  ;;  %p359_p5 = scmp.ge.s32.totalorder %s555_s17, 1 }
   0xb   : > { %p615_p4 = por %p759_p1, %p41_p0  ;;  %p120_p7 = scmp.lt.s32.totalorder %s555_s17, 3 }
   0xc   : > { %p620_p6 = por %p113_p3, %p41_p0  ;;  %s133_s23 = sshll.u32 %s756_s1, 4  ;;  %s134_s23 = int_to_ptr.vmem [resolvable:$true] %s133_s23 }
   0xd   : > { %s763_s19 = scalar_select %p615_p4, 1, 0 }
   0xe   : > { %s764_s20 = scalar_select %p620_p6, 1, 0 }
   0xf   : > { %p628_p8 = pnand %p359_p5, %p120_p7  ;;  %s636_s25 = sadd.s32 1, %s555_s17  }
  0x10   : > { %s25_s27 = ssub.s32 %s555_s17, %s636_s25  ;;  %s28_s29 = sadd.s32 1, %s551_s16 }
  0x11   : > { %s765_s24 = scalar_select %p628_p8, 1, 0 }
  0x12   : > { %p387_p10 = pneg %p628_p8  ;;  %p646_p12 = scmp.eq.s32.totalorder %s25_s27, 0 }
  0x13   : > { %p35_p13 = scmp.ne.s32.totalorder %s551_s16, %s547_s15  ;;  %s444_s30 = scalar_lea.vmem %s134_s23, 16 }
  0x14   : > { %p640_p11 = pnand %p387_p10, %p759_p1  ;;  %p445_p0 = scmp.ne.s32.totalorder %s134_s23, %s444_s30 }
  0x15   : > { %p452_p9 = scmp.lt.s32.totalorder %s134_s23, %s134_s23  ;;  %p453_p2 = scmp.lt.s32.totalorder %s444_s30, %s444_s30 }
  0x16   : > { %p446_p3 = pneg %p640_p11 }
  0x17   : > { %p454_p10 = por %p453_p2, %p452_p9 }
  0x18   : > { %p447_p5 = pnand %p446_p3, %p445_p0 }
  0x1a   : > { %p448_p7 = pneg %p447_p5 }
  0x1c   : > { %p455_p1 = pnand %p454_p10, %p448_p7 }
  0x1e   : > { %458 = shalt.err (!%p455_p1)
}
  0x1f   : > { %s557_s4 = smov [#allocation7]   ;;  %p36_p2 = scmp.eq.s32.totalorder %s555_s17, 0 }
  0x20   : > { %390 = dma.vmem_to_smem (!%p640_p11), %s134_s23, 16, %s557_s4, [#allocation6]  }
  0x21   : > { %s660_s5 = scalar_select %p646_p12, %s551_s16, %s28_s29  }
  0x22   : > { %p768_p1 = scmp.eq.s32.totalorder %s606_s2, 1  ;;  %p400_p0 = scmp.lt.s32.totalorder %s555_s17, 2 }
  0x23   : > { %s147_s7 = sand.u32 1, %s551_s16   ;;  %p37_p3 = por %p36_p2, %p35_p13 }
  0x24   : > { %p668_p9 = por %p768_p1, %p35_p13  ;;  %s362_s8 = sshll.u32 %s147_s7, 3 }
  0x25   : > { %s377_s9 = sshll.u32 %s555_s17, 7  ;;  %s151_s13 = scalar_lea.vmem [#allocation3], %s362_s8 }
  0x26   : > { %s769_s6 = scalar_select %p668_p9, 1, 0 }
  0x27   : > { %s681_s12 = scalar_lea.hbm %s755_s0, %s377_s9  ;;  %s159_s18 = sshll.u32 %s151_s13, 4  ;;  %s160_s18 = int_to_ptr.vmem [resolvable:$true] %s159_s18 }
  0x28   : > { %p683_p11 = pnand %p400_p0, %p37_p3  ;;  %s148_s22 = scalar_lea.sflag [#allocation4], %s147_s7 }
  0x29   : > { %s459_s23 = scalar_lea.hbm %s681_s12, 128  ;;  %s464_s28 = scalar_lea.hbm %s755_s0, 256 }
  0x2a   : > { %p460_p12 = scmp.ne.s32.totalorder %s681_s12, %s459_s23  ;;  %p461_p13 = pneg %p683_p11 }
  0x2b   : > { %p465_p10 = scmp.lt.s32.totalorder %s681_s12, %s755_s0  ;;  %p466_p2 = scmp.lt.s32.totalorder %s464_s28, %s459_s23 }
  0x2c   : > { %p462_p5 = pnand %p461_p13, %p460_p12 }
  0x2d   : > { %p467_p1 = por %p466_p2, %p465_p10 }
  0x2e   : > { %p463_p7 = pneg %p462_p5 }
  0x30   : > { %p468_p0 = pnand %p467_p1, %p463_p7 }
  0x32   : > { %471 = shalt.err (!%p468_p0)
}
  0x33   : > { %s472_s4 = scalar_lea.vmem %s160_s18, 128  ;;  %s558_s7 = smov [#allocation3]  }
  0x34   : > { %p473_p3 = scmp.ne.s32.totalorder %s160_s18, %s472_s4  ;;  %s477_s8 = sshll.u32 %s558_s7, 4  ;;  %s478_s8 = int_to_ptr.vmem [resolvable:$false] %s477_s8 }
  0x35   : > { %s479_s9 = scalar_lea.vmem %s478_s8, 256  ;;  %p480_p12 = scmp.lt.s32.totalorder %s160_s18, %s478_s8 }
  0x36   : > { %p475_p6 = pnand %p473_p3, %p461_p13  ;;  %p481_p5 = scmp.lt.s32.totalorder %s479_s9, %s472_s4 }
  0x38   : > { %p476_p9 = pneg %p475_p6  ;;  %p482_p4 = por %p481_p5, %p480_p12 }
  0x3a   : > { %p483_p8 = pnand %p482_p4, %p476_p9 }
  0x3c   : > { %486 = shalt.err (!%p483_p8)
}
  0x3d   : > { %394 = dma.hbm_to_vmem [thread:$0]  (!%p683_p11), %s681_s12, 128, %s160_s18, %s148_s22  }
  0x3e   : > { %p771_p7 = scmp.ne.s32.totalorder %s765_s24, 0 }
  0x3f   : > { %s704_s10 = sand.u32 (!%p771_p7), 1, %s547_s15   ;;  %p772_p4 = scmp.ne.s32.totalorder (!%p771_p7), %s763_s19, 0 }
  0x40   : > { %168 = sbr.rel (%p771_p7) target bundleno = 409 (0x199), region = 32  ;;  %s366_s11 = sshll.u32 (!%p771_p7), %s704_s10, 3 }
  0x41   : > { %s171_s13 = scalar_lea.sflag (!%p771_p7), [#allocation4], %s704_s10  ;;  %s174_s23 = scalar_lea.vmem (!%p771_p7), [#allocation3], %s366_s11 }
  0x45   : > { %530 = dma.done.wait (%p772_p4), %s171_s13, 128  }
  0x46   : > { %532 = vsyncadd (%p772_p4), %s171_s13, 4294967168  ;;  %p773_p6 = scmp.eq.s32.totalorder %s606_s2, 0 }
  0x48   : > { %534 = dma.done.wait (%p773_p6), [#allocation6], 16   ;;  %p774_p8 = pmov %p773_p6 }
  0x4a   : > { %536 = vsyncadd (%p774_p8), [#allocation6], 4294967280 }
  0x4b   : > { %183 = sfence }
  0x4c   : > { %v202_v0 = vld [vmem:[%s174_s23] sm:$0xff]  ;;  %vm206_vm0 = vcmask 1043456   ;;  %v559_v5 = vmov 0   ;;  %s369_s24 = sld [smem:[#allocation7 + $0x1]]  ;;  %vm216_vm1 = vcmask 1040384   ;;  %vm218_vm2 = vcmask 1044480  }
  0x4d   : > { %v204_v1 = vcombine.high %v202_v0, %v202_v0  ;;  %v207_v2 = vsel %vm206_vm0, %v202_v0, 0.0  ;;  %438 = vset.pattern.permute.xlu0 %v559_v5  ;;  %s370_s12 = sld [smem:[#allocation7 + $0x2]]  ;;  %v560_v27 = vmov 839922192   ;;  %v254_v29 = vlaneseq  ;;  %s378_s21 = sshll.u32 %s606_s2, 7 }
  0x4e   : > { %s220_s19 = sld [smem:[#allocation7]]  ;;  %v252_v28 = vunpack.c.l.s4 %v560_v27  ;;  %s201_s22 = scalar_lea.vmem [#allocation8], %s366_s11 }
  0x4f   : > { %v208_v3 = vsel %vm206_vm0, %v204_v1, 0.0  ;;  %s238_s18 = sld [smem:[#allocation2]]  ;;  %v255_v31 = vshrl.u32 %v254_v29, 7  ;;  %s276_s26 = sshll.u32 %s201_s22, 4  ;;  %s277_s26 = int_to_ptr.vmem [resolvable:$true] %s276_s26 }
  0x50   : > { %v209_v4 = vadd.f32 %v208_v3, %v207_v2  ;;  %v253_v30 = vunpack.c.0.s8 %v252_v28  ;;  %s274_s29 = scalar_lea.hbm %s758_s3, %s378_s21  ;;  %s262_s30 = scalar_lea.sflag [#allocation5], %s704_s10 }
  0x51   : > { %s487_s4 = scalar_lea.vmem %s277_s26, 128  ;;  %p775_p11 = scmp.ne.s32.totalorder %s769_s6, 0 }
  0x52   : > { %210 = vadd.xlane.f32.xlu0 %v209_v4  ;;  %v225_v9 = vstv %s369_s24  ;;  %v256_v32 = vsub.s32 %v253_v30, %v255_v31  ;;  %p488_p9 = scmp.ne.s32.totalorder %s277_s26, %s487_s4  ;;  %s561_s7 = smov [#allocation8]  }
  0x53   : > { %v232_v10 = vstv %s370_s12  ;;  %s491_s8 = sshll.u32 %s561_s7, 4  ;;  %s492_s8 = int_to_ptr.vmem [resolvable:$false] %s491_s8 }
  0x54   : > { %v221_v12 = vstv %s220_s19  ;;  %p489_p13 = pnand %p488_p9, %p775_p11  ;;  %s493_s2 = scalar_lea.vmem %s492_s8, 256 }
  0x55   : > { %v239_v20 = vstv %s238_s18  ;;  %p494_p2 = scmp.lt.s32.totalorder %s277_s26, %s492_s8  ;;  %p495_p1 = scmp.lt.s32.totalorder %s493_s2, %s487_s4 }
  0x56   : > { %p490_p10 = pneg %p489_p13 }
  0x57   : > { %p496_p0 = por %p495_p1, %p494_p2 }
  0x59   : > { %p497_p3 = pnand %p496_p0, %p490_p10 }
  0xdb   : > { %v211_v6 = vpop.xlane.xlu0 %210 }
  0xdc   : > { %v212_v7 = vmul.f32 0.00390625, %v211_v6 }
  0xde   : > { %v214_v8 = vrot.slane %v212_v7, 7 }
  0xe0   : > { %v217_v11 = vsel %vm216_vm1, 0.0, %v214_v8 }
  0xe1   : > { %v219_v13 = vsel %vm218_vm2, %v217_v11, 0.0 }
  0xe2   : > { %v226_v14 = vmul.f32 %v225_v9, %v219_v13  ;;  %v233_v15 = vmul.f32 %v232_v10, %v219_v13  ;;  %v222_v16 = vmul.f32 %v221_v12, %v219_v13 }
  0xe4   : > { %v228_v17 = vrot.slane %v226_v14, 1  ;;  %v235_v19 = vrot.slane %v233_v15, 2 }
  0xe6   : > { %v230_v18 = vadd.f32 %v228_v17, %v222_v16 }
  0xe8   : > { %v237_v21 = vadd.f32 %v235_v19, %v230_v18 }
  0xea   : > { %v240_v22 = vadd.f32 %v239_v20, %v237_v21 }
  0xec   : > { %v371_v23 = vmul.f32 -1.442695, %v240_v22 }
  0xee   : > { %440 = vpow2.f32 %v371_v23 }
  0xfb   : > { %v441_v24 = vpop.eup %440 }
  0xfc   : > { %v244_v25 = vadd.f32 1.0, %v441_v24 }
  0xfe   : > { %442 = vrcp.f32 %v244_v25 }
 0x10b   : > { %v443_v26 = vpop.eup %442 }
 0x10c   : > { %249 = vperm.xlu0 %438, %v443_v26  }
 0x187   : > { %v250_v33 = vpop.permute.xlu0 %249 }
 0x188   : > { %v257_v34 = vrot.slane %v250_v33, %v256_v32 }
 0x18a   : > { %v259_v35 = vmul.f32 %v257_v34, %v202_v0 }
 0x18c   : > { %260 = vst [vmem:[%s201_s22] sm:$0xff] %v259_v35 }
 0x18d   : > { %500 = shalt.err (!%p497_p3)
}
 0x18e   : > { %s501_s9 = scalar_lea.hbm %s274_s29, 128  ;;  %s505_s13 = scalar_lea.hbm %s758_s3, 256 }
 0x18f   : > { %p502_p12 = scmp.ne.s32.totalorder %s274_s29, %s501_s9  ;;  %p506_p4 = scmp.lt.s32.totalorder %s274_s29, %s758_s3 }
 0x190   : > { %p507_p6 = scmp.lt.s32.totalorder %s505_s13, %s501_s9 }
 0x191   : > { %p503_p5 = pnand %p502_p12, %p775_p11 }
 0x192   : > { %p508_p8 = por %p507_p6, %p506_p4 }
 0x193   : > { %p504_p7 = pneg %p503_p5 }
 0x195   : > { %p509_p9 = pnand %p508_p8, %p504_p7 }
 0x197   : > { %512 = shalt.err (!%p509_p9)
}
 0x198   : > { %385 = dma.vmem_to_hbm [thread:$0]  (%p775_p11), %s277_s26, 128, %s274_s29, %s262_s30  }
 0x199 PF: > { %s288_s12 = sand.u32 1, %s543_s14   ;;  %p776_p13 = scmp.ne.s32.totalorder %s764_s20, 0 }
 0x19a   : > { %p777_p10 = scmp.ge.s32.totalorder %s555_s17, 2  ;;  %s289_s19 = scalar_lea.sflag [#allocation5], %s288_s12 }
 0x19c   : > { %p396_p2 = pnand %p777_p10, %p776_p13 }
 0x19e   : > { %p397_p1 = pneg %p396_p2 }
 0x1a0   : > { %538 = dma.done.wait (%p397_p1), %s289_s19, 128  }
 0x1a1   : > { %540 = vsyncadd (%p397_p1), %s289_s19, 4294967168  ;;  %p18_p0 = scmp.ge.s32.totalorder %s636_s25, 4   ;;  %s778_s14 = smov %s547_s15 }
 0x1a2   : > { %s779_s15 = smov %s551_s16  ;;  %s780_s16 = smov %s660_s5 }
 0x1a3   : > { %s781_s17 = smov %s636_s25  ;;  %20 = sbr.rel (!%p18_p0) target bundleno = 8 (0x8), region = 82 }
 0x1a8   :  { %294 = vsyncpa [#allocation4], 1 }
 0x1a9   :  { %296 = vsyncpa [#allocation4 + $0x1], 1 }
 0x1aa   :  { %297 = vsyncpa [#allocation5], 1 }
 0x1ab   :  { %299 = vsyncpa [#allocation5 + $0x1], 1 }
 0x1ac   :  { %300 = vsyncpa [#allocation6], 1 }
 0x1ad   :  { %302 = vsyncpa [#allocation6 + $0x1], 1 }

</bundles_post_ra>
